<compile_context>
chip_gen: v7x
topology: tpu7x:2x2x1
jax: 0.10.0
libtpu: 0.0.40
codegen_flags: <defaults>
</compile_context>

<pallas_src>
import functools
import math

import jax
import jax.numpy as jnp
from jax.experimental import pallas as pl
from jax.experimental.pallas import tpu as pltpu


def _round_up(x, m):
    return ((x + m - 1) // m) * m


def _pick_block(n, want):
    """Largest multiple of 128 that divides n (n is a multiple of 128) and is <= want."""
    b = max(128, (min(want, n) // 128) * 128)
    while n % b:
        b -= 128
    return b


# ------------------------------------------------------------------ stage 1 ---
def gat_project_kernel(h_ref, w_ref, a_ref, z_ref, s_ref):
    """Fused per-head projection + attention-score dot products (all heads at once)."""
    # h_ref: (bp, in_dim)   w_ref: (in_dim, H*D)   a_ref: (H*D, 2H)
    z = jnp.dot(h_ref[...], w_ref[...], preferred_element_type=jnp.float32)   # (bp, H*D)
    z_ref[...] = z.astype(z_ref.dtype)
    # scores[:, 0:H] = a_src . z_head, scores[:, H:2H] = a_dst . z_head (MXU, all heads)
    s_ref[...] = jnp.dot(z, a_ref[...], preferred_element_type=jnp.float32)   # (bp, 2H)


# ------------------------------------------------------------------ stage 2 ---
def gat_attention_kernel(blk_ref, sd_ref, ss_ref, z_ref, adj_ref, out_ref,
                         m_ref, l_ref, acc_ref,
                         *, num_heads, out_dim, negative_slope):
    """One (dst-tile, src-tile) step of online-softmax GAT aggregation, all heads."""
    H, D = num_heads, out_dim
    qi = pl.program_id(0)
    ki = pl.program_id(1)
    nk = pl.num_programs(1)
    neg_big = jnp.float32(-1e30)

    @pl.when(ki == 0)
    def _init():
        m_ref[...] = jnp.full(m_ref.shape, neg_big, dtype=m_ref.dtype)
        l_ref[...] = jnp.zeros(l_ref.shape, dtype=l_ref.dtype)
        acc_ref[...] = jnp.zeros(acc_ref.shape, dtype=acc_ref.dtype)

    # Skip the whole tile's EUP/VPU/MXU work when the adjacency block has no edges.
    @pl.when(blk_ref[qi * nk + ki] > 0)
    def _compute():
        mask = adj_ref[...] > 0                       # (bq, bk) from int8 adjacency tile
        sd = sd_ref[...]                              # (bq, H)  dst scores
        ss = ss_ref[...]                              # (H, bk)  src scores, pre-transposed
        z = z_ref[...]                                # (bk, H*D) projected src features
        m_prev = m_ref[...]                           # (bq, H)  single full-width loads
        l_prev = l_ref[...]                           # (bq, H)
        acc_prev = acc_ref[...]                       # (bq, H*D)

        m_cols, l_cols, acc_cols = [], [], []
        for hd in range(H):                           # H is small & static -> unrolled
            e = sd[:, hd:hd + 1] + ss[hd:hd + 1, :]                    # (bq, bk)
            e = jnp.where(e > 0, e, negative_slope * e)                # leaky_relu
            e = jnp.where(mask, e, neg_big)                            # mask-aware max
            m_new = jnp.maximum(m_prev[:, hd:hd + 1],
                                jnp.max(e, axis=-1, keepdims=True))
            # exp / probabilities in agg dtype (bf16 on v6e/v7x) -> feeds MXU directly
            p = jnp.exp((e - m_new).astype(z.dtype))
            p = jnp.where(mask, p, jnp.zeros((), p.dtype))             # fully-masked rows
            rescale = jnp.exp(m_prev[:, hd:hd + 1] - m_new)            # f32
            l_cols.append(rescale * l_prev[:, hd:hd + 1]
                          + jnp.sum(p, axis=-1, keepdims=True, dtype=jnp.float32))
            col = slice(hd * D, (hd + 1) * D)
            acc_cols.append(rescale * acc_prev[:, col]
                            + jnp.dot(p, z[:, col],
                                      preferred_element_type=jnp.float32))
            m_cols.append(m_new)

        # Single full-width store per scratch per grid step.
        m_ref[...] = jnp.concatenate(m_cols, axis=1)
        l_ref[...] = jnp.concatenate(l_cols, axis=1)
        acc_ref[...] = jnp.concatenate(acc_cols, axis=1)

    @pl.when(ki == nk - 1)
    def _finalize():
        l = l_ref[...]                                               # (bq, H)
        # Isolated / padded dst rows (l == 0) produce 0 instead of NaN.
        inv = 1.0 / jnp.where(l > 0, l, jnp.float32(1.0))            # exact divide, tiny
        bq = acc_ref.shape[0]
        inv_full = jnp.concatenate(
            [jnp.broadcast_to(inv[:, hd:hd + 1], (bq, D)) for hd in range(H)], axis=1)
        out_ref[...] = (acc_ref[...] * inv_full).astype(out_ref.dtype)


# ------------------------------------------------------------------ wrapper ---
def multi_head_gat(h, W, a, adj, *, block_q=256, block_k=512, block_proj=1024,
                   agg_dtype=jnp.bfloat16, negative_slope=0.01):
    """h: (N, in_dim); W: (H, in_dim, D); a: (H, 2, D) (a[:,0]=a_src, a[:,1]=a_dst);
    adj[dst, src]: (N, N). Returns the merged ('cat') output (N, H*D), float32.

    agg_dtype: dtype of the exp / probability / z operands (bf16 recommended on all
    generations; the softmax max/denominator and accumulation stay f32).
    """
    N, in_dim = h.shape
    H, _, D = W.shape
    HD = H * D

    # ---- fold all heads into one wide projection and one score matmul --------
    W_all = jnp.transpose(W, (1, 0, 2)).reshape(in_dim, HD)           # (in_dim, H*D)
    eye = jnp.eye(H, dtype=W.dtype)
    A_src = jnp.einsum('hd,hg->hdg', a[:, 0, :], eye).reshape(HD, H)  # block-diagonal
    A_dst = jnp.einsum('hd,hg->hdg', a[:, 1, :], eye).reshape(HD, H)
    A = jnp.concatenate([A_src, A_dst], axis=1)                       # (H*D, 2H)

    # ---- pad only to a multiple of 128; clamp blocks to divisors of Np -------
    Np = _round_up(N, 128)
    bq = _pick_block(Np, block_q)
    bk = _pick_block(Np, block_k)
    bp = _pick_block(Np, block_proj)        # stage-1 row block (much larger)
    nq, nk = Np // bq, Np // bk

    h_p = jnp.zeros((Np, in_dim), h.dtype).at[:N].set(h)
    adj_p = jnp.zeros((Np, Np), jnp.int8).at[:N, :N].set((adj > 0).astype(jnp.int8))

    # ---- stage 1: projection + attention-score dot products ------------------
    z_all, scores = pl.pallas_call(
        gat_project_kernel,
        out_shape=(jax.ShapeDtypeStruct((Np, HD), agg_dtype),
                   jax.ShapeDtypeStruct((Np, 2 * H), jnp.float32)),
        grid=(Np // bp,),
        in_specs=[
            pl.BlockSpec((bp, in_dim), lambda i: (i, 0)),
            pl.BlockSpec((in_dim, HD), lambda i: (0, 0)),
            pl.BlockSpec((HD, 2 * H), lambda i: (0, 0)),
        ],
        out_specs=(pl.BlockSpec((bp, HD), lambda i: (i, 0)),
                   pl.BlockSpec((bp, 2 * H), lambda i: (i, 0))),
        compiler_params=pltpu.CompilerParams(dimension_semantics=("parallel",)),
    )(h_p, W_all, A)

    # Layout plumbing on tiny arrays (XLA side): dst scores as (Np, H), src scores
    # transposed to (H, Np) so stage 2 never transposes in-kernel.
    s_dst = scores[:, H:]                    # (Np, H)
    s_src_t = scores[:, :H].T                # (H, Np)

    # Per-(dst block, src block) nonempty flags -> kernel skips empty tiles.
    blk = adj_p.astype(jnp.int32).reshape(nq, bq, nk, bk).sum(axis=(1, 3))
    blk_flat = (blk > 0).astype(jnp.int32).reshape(nq * nk)

    kernel = functools.partial(gat_attention_kernel, num_heads=H, out_dim=D,
                               negative_slope=negative_slope)
    out = pl.pallas_call(
        kernel,
        out_shape=jax.ShapeDtypeStruct((Np, HD), jnp.float32),
        grid_spec=pltpu.PrefetchScalarGridSpec(
            num_scalar_prefetch=1,
            grid=(nq, nk),                                          # dst tiles, src tiles
            in_specs=[
                pl.BlockSpec((bq, H), lambda qi, ki, nb: (qi, 0)),   # dst scores
                pl.BlockSpec((H, bk), lambda qi, ki, nb: (0, ki)),   # src scores (transposed)
                pl.BlockSpec((bk, HD), lambda qi, ki, nb: (ki, 0)),  # projected src features
                pl.BlockSpec((bq, bk), lambda qi, ki, nb: (qi, ki)), # int8 adjacency tile
            ],
            out_specs=pl.BlockSpec((bq, HD), lambda qi, ki, nb: (qi, 0)),  # merged output
            scratch_shapes=[
                pltpu.VMEM((bq, H), jnp.float32),    # running max (per head)
                pltpu.VMEM((bq, H), jnp.float32),    # running denominator (per head)
                pltpu.VMEM((bq, HD), jnp.float32),   # running weighted sum (all heads)
            ],
        ),
        compiler_params=pltpu.CompilerParams(
            dimension_semantics=("parallel", "arbitrary"),
            vmem_limit_bytes=48 * 1024 * 1024),      # safe on v7x (64 MiB/TC)
    )(blk_flat, s_dst, s_src_t, z_all, adj_p)

    return out[:N]


# --------------------------------------------------------------- reference ----
def _reference(h, W, a, adj):
    """Pure-JAX reference (HIGHEST-precision matmuls) of the same forward pass."""
    H = W.shape[0]
    hp = jax.lax.Precision.HIGHEST
    outs = []
    for hd in range(H):
        z = jnp.dot(h, W[hd], precision=hp)
        s_src = jnp.dot(z, a[hd, 0], precision=hp)
        s_dst = jnp.dot(z, a[hd, 1], precision=hp)
        e = s_dst[:, None] + s_src[None, :]
        e = jnp.where(e > 0, e, 0.01 * e)
        e = jnp.where(adj > 0, e, -jnp.inf)
        alpha = jax.nn.softmax(e, axis=-1)
        alpha = jnp.where(adj > 0, alpha, 0.0)
        outs.append(jnp.dot(alpha, z, precision=hp))
    return jnp.concatenate(outs, axis=1)


def _ring_graph(N):
    adj = jnp.zeros((N, N), dtype=jnp.float32)
    idx = jnp.arange(N)
    adj = adj.at[idx, idx].set(1.0)             # self loops
    adj = adj.at[idx, (idx - 1) % N].set(1.0)   # edge (i-1) -> i
    return adj


def _make_inputs(key, N, in_dim, out_dim, num_heads):
    k_h, k_fc, k_attn = jax.random.split(key, 3)
    h = jax.random.normal(k_h, (N, in_dim), dtype=jnp.float32)
    gain = math.sqrt(2.0)                                       # calculate_gain('relu')
    fc_std = gain * math.sqrt(2.0 / (in_dim + out_dim))         # xavier_normal_ fc.weight
    attn_std = gain * math.sqrt(2.0 / (2 * out_dim + 1))        # xavier_normal_ attn_fc
    W = fc_std * jax.random.normal(k_fc, (num_heads, in_dim, out_dim), dtype=jnp.float32)
    a = attn_std * jax.random.normal(k_attn, (num_heads, 2, out_dim), dtype=jnp.float32)
    return h, W, a


def _norm_max_err(x, y):
    return float(jnp.max(jnp.abs(x - y)) / (jnp.max(jnp.abs(y)) + 1e-6))


if __name__ == "__main__":
    in_dim, out_dim, num_heads = 16, 8, 4

    # --- check 1: small graph, f32 exp/aggregation operands ------------------
    N = 8
    h, W, a = _make_inputs(jax.random.PRNGKey(0), N, in_dim, out_dim, num_heads)
    adj = _ring_graph(N)
    out = jax.block_until_ready(multi_head_gat(h, W, a, adj, agg_dtype=jnp.float32))
    ref = _reference(h, W, a, adj)
    assert out.shape == (N, num_heads * out_dim), out.shape
    # DEFAULT-precision MXU matmuls (bf16 operand passes) bound agreement; a semantic
    # bug would give normalized errors ~O(1).
    err = _norm_max_err(out, ref)
    assert err < 3e-2, f"f32 mismatch vs reference (normalized max err {err:.3e})"

    # --- check 2: multi-tile grid + padding + empty-tile skipping + bf16 ops ---
    N2 = 300
    h2, W2, a2 = _make_inputs(jax.random.PRNGKey(0), N2, in_dim, out_dim, num_heads)
    adj2 = _ring_graph(N2)
    out2 = jax.block_until_ready(
        multi_head_gat(h2, W2, a2, adj2, block_q=128, block_k=128))
    ref2 = _reference(h2, W2, a2, adj2)
    assert out2.shape == (N2, num_heads * out_dim), out2.shape
    err2 = _norm_max_err(out2, ref2)
    assert err2 < 6e-2, f"bf16 mismatch vs reference (normalized max err {err2:.3e})"

    print("KERNEL_OK")
</pallas_src>

<mosaic_0001>
module attributes {stable_mosaic.version = 11 : i64} {
  func.func @gat_project_kernel(%arg0: i32, %arg1: memref<128x16xf32, #tpu.memory_space<vmem>>, %arg2: memref<16x32xf32, #tpu.memory_space<vmem>>, %arg3: memref<32x8xf32, #tpu.memory_space<vmem>>, %arg4: memref<128x32xf32, #tpu.memory_space<vmem>>, %arg5: memref<128x8xf32, #tpu.memory_space<vmem>>) attributes {dimension_semantics = [#tpu.dimension_semantics<parallel>], iteration_bounds = array<i64: 1>, scalar_prefetch = 0 : i64, scratch_operands = 0 : i64, tpu.core_type = #tpu.core_type<tc>, window_params = [{transform_indices = @transform_0, window_bounds = array<i64: 128, 16>}, {pipeline_mode = #tpu.pipeline_mode<synchronous>, transform_indices = @transform_1, window_bounds = array<i64: 16, 32>}, {pipeline_mode = #tpu.pipeline_mode<synchronous>, transform_indices = @transform_2, window_bounds = array<i64: 32, 8>}, {transform_indices = @transform_3, window_bounds = array<i64: 128, 32>}, {transform_indices = @transform_4, window_bounds = array<i64: 128, 8>}]} {
    %c0 = arith.constant 0 : index
    %c0_0 = arith.constant 0 : index
    %0 = vector.load %arg1[%c0, %c0_0] : memref<128x16xf32, #tpu.memory_space<vmem>>, vector<128x16xf32>
    %c0_1 = arith.constant 0 : index
    %c0_2 = arith.constant 0 : index
    %1 = vector.load %arg2[%c0_1, %c0_2] : memref<16x32xf32, #tpu.memory_space<vmem>>, vector<16x32xf32>
    %cst = arith.constant dense<0.000000e+00> : vector<128x32xf32>
    %2 = tpu.matmul %0, %1, %cst {dimension_numbers = #tpu.dot_dimension_numbers<[1], [0], [0], [1], [0, 0, 1, 1], [], []>} : vector<128x16xf32>, vector<16x32xf32>, vector<128x32xf32> -> vector<128x32xf32>
    %c0_3 = arith.constant 0 : index
    %c0_4 = arith.constant 0 : index
    %3 = vector.load %arg4[%c0_3, %c0_4] : memref<128x32xf32, #tpu.memory_space<vmem>>, vector<128x32xf32>
    tpu.vector_store %arg4[%c0_3, %c0_4], %2 {strides = array<i32>} : memref<128x32xf32, #tpu.memory_space<vmem>>, vector<128x32xf32>,
    %c0_5 = arith.constant 0 : index
    %c0_6 = arith.constant 0 : index
    %4 = vector.load %arg3[%c0_5, %c0_6] : memref<32x8xf32, #tpu.memory_space<vmem>>, vector<32x8xf32>
    %cst_7 = arith.constant dense<0.000000e+00> : vector<128x8xf32>
    %5 = tpu.matmul %2, %4, %cst_7 {dimension_numbers = #tpu.dot_dimension_numbers<[1], [0], [0], [1], [0, 0, 1, 1], [], []>} : vector<128x32xf32>, vector<32x8xf32>, vector<128x8xf32> -> vector<128x8xf32>
    %c0_8 = arith.constant 0 : index
    %c0_9 = arith.constant 0 : index
    %6 = vector.load %arg5[%c0_8, %c0_9] : memref<128x8xf32, #tpu.memory_space<vmem>>, vector<128x8xf32>
    tpu.vector_store %arg5[%c0_8, %c0_9], %5 {strides = array<i32>} : memref<128x8xf32, #tpu.memory_space<vmem>>, vector<128x8xf32>,
    return
  }
  func.func @transform_0(%arg0: i32) -> (i32, i32) {
    %c0_i32 = arith.constant 0 : i32
    %c0_i32_0 = arith.constant 0 : i32
    return %arg0, %c0_i32 : i32, i32
  }
  func.func @transform_1(%arg0: i32) -> (i32, i32) {
    %c0_i32 = arith.constant 0 : i32
    %c0_i32_0 = arith.constant 0 : i32
    %c0_i32_1 = arith.constant 0 : i32
    return %c0_i32, %c0_i32_0 : i32, i32
  }
  func.func @transform_2(%arg0: i32) -> (i32, i32) {
    %c0_i32 = arith.constant 0 : i32
    %c0_i32_0 = arith.constant 0 : i32
    %c0_i32_1 = arith.constant 0 : i32
    return %c0_i32, %c0_i32_0 : i32, i32
  }
  func.func @transform_3(%arg0: i32) -> (i32, i32) {
    %c0_i32 = arith.constant 0 : i32
    %c0_i32_0 = arith.constant 0 : i32
    return %arg0, %c0_i32 : i32, i32
  }
  func.func @transform_4(%arg0: i32) -> (i32, i32) {
    %c0_i32 = arith.constant 0 : i32
    %c0_i32_0 = arith.constant 0 : i32
    return %arg0, %c0_i32 : i32, i32
  }
}

</mosaic_0001>

<bundles_post_ra>
// kernel: tpu_custom_call.1
= control target key start
LH: loop header
LB: loop body
LE: loop exit
PB: predicated region body
PF: predicated region fallthrough
CT: control target
= control target key end

     0   :  { %vm34_vm0 = vcmask 130048   ;;  %vm228_vm1 = vcmask 261120   ;;  %vm442_vm2 = vcmask 64512   ;;  %s860_s1 = inlined_call_operand.vmem [shape: f32[16,32], index: 1, kind: input, shape index: {}]   ;;  %s861_s0 = inlined_call_operand.vmem [shape: f32[128,16], index: 0, kind: input, shape index: {}]   ;;  %s862_s2 = inlined_call_operand.vmem [shape: f32[32,8], index: 2, kind: input, shape index: {}]   ;;  %s863_s3 = inlined_call_operand.vmem [shape: f32[128,32], index: 3, kind: output, shape index: {0}]   ;;  %s864_s4 = inlined_call_operand.vmem [shape: f32[128,8], index: 4, kind: output, shape index: {1}]  }
   0x1   :  { %v32_v0 = vld [vmem:[%s860_s1] sm:$0xff]  ;;  %v33_v1 = vld [vmem:[%s860_s1 + $0x8] sm:$0xff]  ;;  %v18_v5 = vld [vmem:[%s861_s0 + $0x10] sm:$0xff] }
   0x2   :  { %v16_v2 = vld [vmem:[%s861_s0] sm:$0xff]  ;;  %v597_v3 = vpack.c.bf16 %v33_v1, %v32_v0  ;;  %v17_v4 = vld [vmem:[%s861_s0 + $0x8] sm:$0xff]  ;;  %v247_v8 = vld [vmem:[%s862_s2 + $0x10] sm:$0xff] }
   0x3   :  { %541 = vmatprep.mubr.msk.f32.mxu0 %vm34_vm0, %v16_v2  ;;  %v245_v6 = vld [vmem:[%s862_s2] sm:$0xff]  ;;  %v246_v7 = vld [vmem:[%s862_s2 + $0x8] sm:$0xff]  ;;  %v248_v10 = vld [vmem:[%s862_s2 + $0x18] sm:$0xff] }
   0x4   :  { %598 = vmatprep.subr.bf16.mxu0 %v597_v3  ;;  %v601_v9 = vpack.c.bf16 %v246_v7, %v245_v6  ;;  %v19_v11 = vld [vmem:[%s861_s0 + $0x18] sm:$0xff]  ;;  %v605_v12 = vpack.c.bf16 %v248_v10, %v247_v8  ;;  %v20_v13 = vld [vmem:[%s861_s0 + $0x20] sm:$0xff]  ;;  %v21_v14 = vld [vmem:[%s861_s0 + $0x28] sm:$0xff] }
   0x5   :  { %600 = vmatpush3.bf16.msra.mxu0 %v597_v3  ;;  %v22_v15 = vld [vmem:[%s861_s0 + $0x30] sm:$0xff]  ;;  %v23_v16 = vld [vmem:[%s861_s0 + $0x38] sm:$0xff]  ;;  %v24_v17 = vld [vmem:[%s861_s0 + $0x40] sm:$0xff] }
   0x6   :  { %602 = vmatprep.subr.bf16.mxu1 %v601_v9  ;;  %v25_v18 = vld [vmem:[%s861_s0 + $0x48] sm:$0xff]  ;;  %v26_v19 = vld [vmem:[%s861_s0 + $0x50] sm:$0xff]  ;;  %v27_v20 = vld [vmem:[%s861_s0 + $0x58] sm:$0xff] }
   0x7   :  { %604 = vmatpush3.bf16.msra.mxu1 %v601_v9  ;;  %v28_v21 = vld [vmem:[%s861_s0 + $0x60] sm:$0xff]  ;;  %v29_v22 = vld [vmem:[%s861_s0 + $0x68] sm:$0xff]  ;;  %v30_v23 = vld [vmem:[%s861_s0 + $0x70] sm:$0xff] }
   0x8   :  { %542 = vmatmul.mubr.msk.f32.vlgmr.msra.gmra.mrb[0].mxu0 %vm34_vm0, %v17_v4  ;;  %606 = vmatprep.subr.bf16.mxu1 %v605_v12  ;;  %v31_v24 = vld [vmem:[%s861_s0 + $0x78] sm:$0xff] }
   0x9   :  { %544 = vmatprep.mubr.msk.f32.mxu0 %vm34_vm0, %v18_v5 }
   0xb   :  { %608 = vmatpush3.bf16.msra.mxu1 %v605_v12 }
   0xc   :  { %545 = vmatmul.mubr.msk.f32.gmra.mrb[2].mxu0 %vm34_vm0, %v19_v11 }
   0xd   :  { %547 = vmatprep.mubr.msk.f32.mxu0 %vm34_vm0, %v20_v13 }
  0x10   :  { %548 = vmatmul.mubr.msk.f32.gmra.mrb[4].mxu0 %vm34_vm0, %v21_v14 }
  0x11   :  { %550 = vmatprep.mubr.msk.f32.mxu0 %vm34_vm0, %v22_v15 }
  0x14   :  { %551 = vmatmul.mubr.msk.f32.gmra.mrb[6].mxu0 %vm34_vm0, %v23_v16 }
  0x15   :  { %553 = vmatprep.mubr.msk.f32.mxu0 %vm34_vm0, %v24_v17 }
  0x18   :  { %554 = vmatmul.mubr.msk.f32.gmra.mrb[8].mxu0 %vm34_vm0, %v25_v18 }
  0x19   :  { %556 = vmatprep.mubr.msk.f32.mxu0 %vm34_vm0, %v26_v19 }
  0x1c   :  { %557 = vmatmul.mubr.msk.f32.gmra.mrb[10].mxu0 %vm34_vm0, %v27_v20 }
  0x1d   :  { %559 = vmatprep.mubr.msk.f32.mxu0 %vm34_vm0, %v28_v21 }
  0x20   :  { %560 = vmatmul.mubr.msk.f32.gmra.mrb[12].mxu0 %vm34_vm0, %v29_v22 }
  0x21   :  { %562 = vmatprep.mubr.msk.f32.mxu0 %vm34_vm0, %v30_v23 }
  0x24   :  { %563 = vmatmul.mubr.msk.f32.gmra.mrb[14].mxu0 %vm34_vm0, %v31_v24 }
  0xdb   :  { %v543_v25 = vpop.f32.mrb[0].mxu0 }
  0xdc   :  { %230 = vst.msk [vmem:[%s863_s3 + $0x8] sm:$0xff] %vm228_vm1, %v543_v25  ;;  %v149_v26 = vpop.f32.mrb[1].mxu0 }
  0xdd   :  { %229 = vst.msk [vmem:[%s863_s3] sm:$0xff] %vm228_vm1, %v149_v26  ;;  %573 = vmatprep.mubr.msk.f32.mxu1 %vm228_vm1, %v149_v26 }
  0xde   :  { %574 = vmatmul.mubr.msk.f32.vlgmr.msra.gmra.mrb[0].mxu1 %vm228_vm1, %v543_v25 }
  0xdf   :  { %v546_v27 = vpop.f32.mrb[2].mxu0 }
  0xe0   :  { %232 = vst.msk [vmem:[%s863_s3 + $0x18] sm:$0xff] %vm228_vm1, %v546_v27  ;;  %v159_v28 = vpop.f32.mrb[3].mxu0 }
  0xe1   :  { %231 = vst.msk [vmem:[%s863_s3 + $0x10] sm:$0xff] %vm228_vm1, %v159_v28  ;;  %576 = vmatprep.mubr.msk.f32.mxu1 %vm228_vm1, %v159_v28 }
  0xe2   :  { %577 = vmatmul.mubr.msk.f32.gmra.mrb[2].mxu1 %vm228_vm1, %v546_v27 }
  0xe3   :  { %v549_v29 = vpop.f32.mrb[4].mxu0 }
  0xe4   :  { %234 = vst.msk [vmem:[%s863_s3 + $0x28] sm:$0xff] %vm228_vm1, %v549_v29  ;;  %v169_v30 = vpop.f32.mrb[5].mxu0 }
  0xe5   :  { %233 = vst.msk [vmem:[%s863_s3 + $0x20] sm:$0xff] %vm228_vm1, %v169_v30  ;;  %579 = vmatprep.mubr.msk.f32.mxu1 %vm228_vm1, %v169_v30 }
  0xe6   :  { %580 = vmatmul.mubr.msk.f32.gmra.mrb[4].mxu1 %vm228_vm1, %v549_v29 }
  0xe7   :  { %v552_v31 = vpop.f32.mrb[6].mxu0 }
  0xe8   :  { %236 = vst.msk [vmem:[%s863_s3 + $0x38] sm:$0xff] %vm228_vm1, %v552_v31  ;;  %v179_v32 = vpop.f32.mrb[7].mxu0 }
  0xe9   :  { %235 = vst.msk [vmem:[%s863_s3 + $0x30] sm:$0xff] %vm228_vm1, %v179_v32  ;;  %582 = vmatprep.mubr.msk.f32.mxu1 %vm228_vm1, %v179_v32 }
  0xea   :  { %583 = vmatmul.mubr.msk.f32.gmra.mrb[6].mxu1 %vm228_vm1, %v552_v31 }
  0xeb   :  { %v555_v33 = vpop.f32.mrb[8].mxu0 }
  0xec   :  { %238 = vst.msk [vmem:[%s863_s3 + $0x48] sm:$0xff] %vm228_vm1, %v555_v33  ;;  %v189_v34 = vpop.f32.mrb[9].mxu0 }
  0xed   :  { %237 = vst.msk [vmem:[%s863_s3 + $0x40] sm:$0xff] %vm228_vm1, %v189_v34  ;;  %585 = vmatprep.mubr.msk.f32.mxu1 %vm228_vm1, %v189_v34 }
  0xee   :  { %586 = vmatmul.mubr.msk.f32.gmra.mrb[8].mxu1 %vm228_vm1, %v555_v33 }
  0xef   :  { %v558_v35 = vpop.f32.mrb[10].mxu0 }
  0xf0   :  { %240 = vst.msk [vmem:[%s863_s3 + $0x58] sm:$0xff] %vm228_vm1, %v558_v35  ;;  %v199_v36 = vpop.f32.mrb[11].mxu0 }
  0xf1   :  { %239 = vst.msk [vmem:[%s863_s3 + $0x50] sm:$0xff] %vm228_vm1, %v199_v36  ;;  %588 = vmatprep.mubr.msk.f32.mxu1 %vm228_vm1, %v199_v36 }
  0xf2   :  { %589 = vmatmul.mubr.msk.f32.gmra.mrb[10].mxu1 %vm228_vm1, %v558_v35 }
  0xf3   :  { %v561_v37 = vpop.f32.mrb[12].mxu0 }
  0xf4   :  { %242 = vst.msk [vmem:[%s863_s3 + $0x68] sm:$0xff] %vm228_vm1, %v561_v37  ;;  %v209_v38 = vpop.f32.mrb[13].mxu0 }
  0xf5   :  { %241 = vst.msk [vmem:[%s863_s3 + $0x60] sm:$0xff] %vm228_vm1, %v209_v38  ;;  %591 = vmatprep.mubr.msk.f32.mxu1 %vm228_vm1, %v209_v38 }
  0xf6   :  { %592 = vmatmul.mubr.msk.f32.gmra.mrb[12].mxu1 %vm228_vm1, %v561_v37 }
  0xf7   :  { %v564_v39 = vpop.f32.mrb[14].mxu0 }
  0xf8   :  { %244 = vst.msk [vmem:[%s863_s3 + $0x78] sm:$0xff] %vm228_vm1, %v564_v39  ;;  %v219_v40 = vpop.f32.mrb[15].mxu0 }
  0xf9   :  { %243 = vst.msk [vmem:[%s863_s3 + $0x70] sm:$0xff] %vm228_vm1, %v219_v40  ;;  %594 = vmatprep.mubr.msk.f32.mxu1 %vm228_vm1, %v219_v40 }
  0xfa   :  { %595 = vmatmul.mubr.msk.f32.gmra.mrb[14].mxu1 %vm228_vm1, %v564_v39 }
 0x1b1   :  { %v575_v41 = vpop.f32.mrb[0].mxu1 }
 0x1b2   :  { %444 = vst.msk [vmem:[%s864_s4 + $0x8] sm:$0xff] %vm442_vm2, %v575_v41  ;;  %v363_v42 = vpop.f32.mrb[1].mxu1 }
 0x1b3   :  { %443 = vst.msk [vmem:[%s864_s4] sm:$0xff] %vm442_vm2, %v363_v42 }
 0x1b5   :  { %v578_v43 = vpop.f32.mrb[2].mxu1 }
 0x1b6   :  { %446 = vst.msk [vmem:[%s864_s4 + $0x18] sm:$0xff] %vm442_vm2, %v578_v43  ;;  %v373_v44 = vpop.f32.mrb[3].mxu1 }
 0x1b7   :  { %445 = vst.msk [vmem:[%s864_s4 + $0x10] sm:$0xff] %vm442_vm2, %v373_v44 }
 0x1b9   :  { %v581_v45 = vpop.f32.mrb[4].mxu1 }
 0x1ba   :  { %448 = vst.msk [vmem:[%s864_s4 + $0x28] sm:$0xff] %vm442_vm2, %v581_v45  ;;  %v383_v46 = vpop.f32.mrb[5].mxu1 }
 0x1bb   :  { %447 = vst.msk [vmem:[%s864_s4 + $0x20] sm:$0xff] %vm442_vm2, %v383_v46 }
 0x1bd   :  { %v584_v47 = vpop.f32.mrb[6].mxu1 }
 0x1be   :  { %450 = vst.msk [vmem:[%s864_s4 + $0x38] sm:$0xff] %vm442_vm2, %v584_v47  ;;  %v393_v48 = vpop.f32.mrb[7].mxu1 }
 0x1bf   :  { %449 = vst.msk [vmem:[%s864_s4 + $0x30] sm:$0xff] %vm442_vm2, %v393_v48 }
 0x1c1   :  { %v587_v49 = vpop.f32.mrb[8].mxu1 }
 0x1c2   :  { %452 = vst.msk [vmem:[%s864_s4 + $0x48] sm:$0xff] %vm442_vm2, %v587_v49  ;;  %v403_v50 = vpop.f32.mrb[9].mxu1 }
 0x1c3   :  { %451 = vst.msk [vmem:[%s864_s4 + $0x40] sm:$0xff] %vm442_vm2, %v403_v50 }
 0x1c5   :  { %v590_v51 = vpop.f32.mrb[10].mxu1 }
 0x1c6   :  { %454 = vst.msk [vmem:[%s864_s4 + $0x58] sm:$0xff] %vm442_vm2, %v590_v51  ;;  %v413_v52 = vpop.f32.mrb[11].mxu1 }
 0x1c7   :  { %453 = vst.msk [vmem:[%s864_s4 + $0x50] sm:$0xff] %vm442_vm2, %v413_v52 }
 0x1c9   :  { %v593_v53 = vpop.f32.mrb[12].mxu1 }
 0x1ca   :  { %456 = vst.msk [vmem:[%s864_s4 + $0x68] sm:$0xff] %vm442_vm2, %v593_v53  ;;  %v423_v54 = vpop.f32.mrb[13].mxu1 }
 0x1cb   :  { %455 = vst.msk [vmem:[%s864_s4 + $0x60] sm:$0xff] %vm442_vm2, %v423_v54 }
 0x1cd   :  { %v596_v55 = vpop.f32.mrb[14].mxu1 }
 0x1ce   :  { %458 = vst.msk [vmem:[%s864_s4 + $0x78] sm:$0xff] %vm442_vm2, %v596_v55  ;;  %v433_v56 = vpop.f32.mrb[15].mxu1 }
 0x1cf   :  { %457 = vst.msk [vmem:[%s864_s4 + $0x70] sm:$0xff] %vm442_vm2, %v433_v56 }

</bundles_post_ra>
